<compile_context>
chip_gen: v7x
topology: tpu7x:2x2x1
jax: 0.10.0
libtpu: 0.0.40
codegen_flags: <defaults>
</compile_context>

<pallas_src>
import functools

import jax
import jax.numpy as jnp
from jax.experimental import pallas as pl
from jax.experimental.pallas import tpu as pltpu


def _round_up(x, m):
    return ((x + m - 1) // m) * m


def _default_elementwise_dtype():
    """bf16 tanh on v6e/v7x (bf16 VPU/EUP); f32 on v5e and anything unknown."""
    try:
        kind = jax.devices()[0].device_kind.lower()
    except Exception:
        return jnp.float32
    if ("v6" in kind) or ("v7" in kind):
        return jnp.bfloat16
    return jnp.float32


def _pick_tile(b16):
    """Rows per grid step.  b16 = batch rounded up to 16 (bf16 sublanes)."""
    if b16 <= 256:
        return b16                      # one step; batch already small
    if b16 <= 2048:
        # >=2 grid steps so v7x megacore can split the batch across its 2 TCs
        return _round_up((b16 + 1) // 2, 16)
    # large batch: big tiles to amortize per-step overhead, minimize dead rows
    best_tb, best_waste = None, None
    for tb in (1024, 512, 256):         # larger first -> preferred on ties
        waste = _round_up(b16, tb) - b16
        if best_waste is None or waste < best_waste:
            best_tb, best_waste = tb, waste
    return best_tb


def expert_kernel(action_dim, ew_dtype,
                  x_ref,
                  w1_ref, b1_ref,
                  w2_ref, b2_ref,
                  w3_ref, b3_ref,
                  wh_ref, bh_ref,
                  out_ref):
    bf16 = jnp.bfloat16

    def enc_layer(a, w_ref, b_ref):
        # bf16 matmul inputs, f32 MXU accumulation; tanh in ew_dtype
        # (bf16 on v6e/v7x, f32 on v5e); cast back to bf16 for next matmul.
        acc = jnp.dot(a, w_ref[...], preferred_element_type=jnp.float32)
        acc = acc + b_ref[...]
        return jnp.tanh(acc.astype(ew_dtype)).astype(bf16)

    h = enc_layer(x_ref[...], w1_ref, b1_ref)   # x already bf16
    h = enc_layer(h, w2_ref, b2_ref)
    h = enc_layer(h, w3_ref, b3_ref)

    # fused heads: one lane-dense matmul.  Columns [0, A) = mu (identity),
    # [A, 2A) = sigma pre-activation (softplus), remainder is zero padding.
    z = jnp.dot(h, wh_ref[...], preferred_element_type=jnp.float32) + bh_ref[...]
    col = jax.lax.broadcasted_iota(jnp.int32, z.shape, 1)
    is_sigma = jnp.logical_and(col >= action_dim, col < 2 * action_dim)
    # overflow-guarded softplus, kept in f32 (only 128 lanes -> cheap)
    sp = jnp.where(z > 20.0, z, jnp.log(1.0 + jnp.exp(jnp.minimum(z, 20.0))))
    out_ref[...] = jnp.where(is_sigma, sp, z)


def pack_params(p, obs_dim, action_dim):
    """Pad / cast PyTorch-layout f32 params into the kernel layout:
    weights (in, out) bf16 (K padded only to 16, heads fused + lane-padded),
    biases (1, out) f32."""
    bf16 = jnp.bfloat16
    k1 = _round_up(max(obs_dim, 1), 16)           # bf16 sublane multiple
    h_out = _round_up(2 * action_dim, 128)        # lane-dense fused head

    w1 = jnp.zeros((k1, 512), bf16).at[:obs_dim, :].set(p["w1"].astype(bf16))

    wh = jnp.zeros((128, h_out), bf16)
    wh = wh.at[:, :action_dim].set(p["wmu"].astype(bf16))
    wh = wh.at[:, action_dim:2 * action_dim].set(p["wsig"].astype(bf16))
    bh = jnp.zeros((1, h_out), jnp.float32)
    bh = bh.at[:, :action_dim].set(p["bmu"])
    bh = bh.at[:, action_dim:2 * action_dim].set(p["bsig"])

    return {
        "w1": w1, "b1": p["b1"],
        "w2": p["w2"].astype(bf16), "b2": p["b2"],
        "w3": p["w3"].astype(bf16), "b3": p["b3"],
        "wh": wh, "bh": bh,
    }


def expert_forward(x, packed, action_dim, ew_dtype=None):
    """x: (B, obs_dim) float.  packed: output of pack_params."""
    B, obs_dim = x.shape
    k1 = packed["w1"].shape[0]
    h_out = packed["wh"].shape[1]
    if ew_dtype is None:
        ew_dtype = _default_elementwise_dtype()

    # batch tiling: bf16 x blocks need 16-row sublane granularity
    b16 = _round_up(max(B, 1), 16)
    tb = _pick_tile(b16)
    b_pad = _round_up(b16, tb)

    # x streamed in bf16; padding via fusable jnp.pad (no 128-wide K blowup)
    x_pad = jnp.pad(x.astype(jnp.bfloat16),
                    ((0, b_pad - B), (0, k1 - obs_dim)))

    batch_map = lambda i: (i, 0)   # walks the batch axis
    const_map = lambda i: (0, 0)   # weights/biases stay VMEM-resident

    # advisory cost for the XLA scheduler
    flops = 2 * b_pad * (k1 * 512 + 512 * 256 + 256 * 128 + 128 * h_out)
    transcendentals = b_pad * (512 + 256 + 128 + h_out)
    weight_bytes = 2 * (k1 * 512 + 512 * 256 + 256 * 128 + 128 * h_out)
    bias_bytes = 4 * (512 + 256 + 128 + h_out)
    bytes_accessed = (weight_bytes + bias_bytes
                      + 2 * b_pad * k1 + 4 * b_pad * h_out)

    out = pl.pallas_call(
        functools.partial(expert_kernel, action_dim, ew_dtype),
        out_shape=jax.ShapeDtypeStruct((b_pad, h_out), jnp.float32),
        grid_spec=pltpu.PrefetchScalarGridSpec(
            num_scalar_prefetch=0,
            grid=(b_pad // tb,),
            in_specs=[
                pl.BlockSpec((tb, k1), batch_map),
                pl.BlockSpec((k1, 512), const_map), pl.BlockSpec((1, 512), const_map),
                pl.BlockSpec((512, 256), const_map), pl.BlockSpec((1, 256), const_map),
                pl.BlockSpec((256, 128), const_map), pl.BlockSpec((1, 128), const_map),
                pl.BlockSpec((128, h_out), const_map), pl.BlockSpec((1, h_out), const_map),
            ],
            out_specs=pl.BlockSpec((tb, h_out), batch_map),
        ),
        compiler_params=pltpu.CompilerParams(
            dimension_semantics=("parallel",)),
        cost_estimate=pl.CostEstimate(
            flops=flops,
            transcendentals=transcendentals,
            bytes_accessed=bytes_accessed),
    )(x_pad,
      packed["w1"], packed["b1"],
      packed["w2"], packed["b2"],
      packed["w3"], packed["b3"],
      packed["wh"], packed["bh"])

    mu = out[:B, :action_dim]
    sigma = out[:B, action_dim:2 * action_dim]
    return mu, sigma


def init_params(key, obs_dim, action_dim):
    """Deterministic synthetic init (PyTorch-style uniform +-1/sqrt(fan_in)).
    Weights (in, out) f32; biases (1, out) f32 (PyTorch nn.Linear transposed)."""
    dims = [(obs_dim, 512), (512, 256), (256, 128)]
    names = ["1", "2", "3"]
    params = {}
    keys = jax.random.split(key, 10)
    ki = 0
    for (din, dout), n in zip(dims, names):
        bound = 1.0 / (din ** 0.5)
        params["w" + n] = jax.random.uniform(
            keys[ki], (din, dout), jnp.float32, -bound, bound); ki += 1
        params["b" + n] = jax.random.uniform(
            keys[ki], (1, dout), jnp.float32, -bound, bound); ki += 1
    for n, dout in [("mu", action_dim), ("sig", action_dim)]:
        bound = 1.0 / (128.0 ** 0.5)
        params["w" + n] = jax.random.uniform(
            keys[ki], (128, dout), jnp.float32, -bound, bound); ki += 1
        params["b" + n] = jax.random.uniform(
            keys[ki], (1, dout), jnp.float32, -bound, bound); ki += 1
    return params


def expert_reference_f32(x, p):
    """Full-precision pure-JAX reference (matches the PyTorch module)."""
    h = jnp.tanh(x @ p["w1"] + p["b1"])
    h = jnp.tanh(h @ p["w2"] + p["b2"])
    h = jnp.tanh(h @ p["w3"] + p["b3"])
    mu = h @ p["wmu"] + p["bmu"]
    sigma = jax.nn.softplus(h @ p["wsig"] + p["bsig"])
    return mu, sigma


def expert_reference_matched(x, p, ew_dtype):
    """Pure-JAX reference mirroring the kernel's exact precision path."""
    bf16 = jnp.bfloat16
    f32 = jnp.float32

    def mm(a, w):
        return jnp.dot(a.astype(bf16), w.astype(bf16),
                       preferred_element_type=f32)

    def layer(a, w, b):
        return jnp.tanh((mm(a, w) + b).astype(ew_dtype)).astype(bf16)

    h = layer(x, p["w1"], p["b1"])
    h = layer(h, p["w2"], p["b2"])
    h = layer(h, p["w3"], p["b3"])
    mu = mm(h, p["wmu"]) + p["bmu"]
    z = mm(h, p["wsig"]) + p["bsig"]
    sigma = jnp.where(z > 20.0, z, jnp.log(1.0 + jnp.exp(jnp.minimum(z, 20.0))))
    return mu, sigma


if __name__ == "__main__":
    obs_dim = 32
    action_dim = 8
    batch = 8

    key = jax.random.PRNGKey(0)
    kx, kp = jax.random.split(key)
    x = jax.random.normal(kx, (batch, obs_dim), dtype=jnp.float32)
    params = init_params(kp, obs_dim, action_dim)
    packed = pack_params(params, obs_dim, action_dim)

    ew_dtype = _default_elementwise_dtype()
    mu, sigma = expert_forward(x, packed, action_dim, ew_dtype=ew_dtype)
    jax.block_until_ready((mu, sigma))

    # exact-path check against a reference that mirrors the kernel's precision
    mu_m, sigma_m = expert_reference_matched(x, params, ew_dtype)
    tol = 3e-3 if ew_dtype == jnp.float32 else 3e-2
    assert jnp.allclose(mu, mu_m, atol=tol, rtol=tol), "mu mismatch (matched ref)"
    assert jnp.allclose(sigma, sigma_m, atol=tol, rtol=tol), "sigma mismatch (matched ref)"

    # looser check against the full-f32 reference (bf16 quantization error)
    mu_f, sigma_f = expert_reference_f32(x, params)
    assert jnp.allclose(mu, mu_f, atol=5e-2, rtol=5e-2), "mu mismatch (f32 ref)"
    assert jnp.allclose(sigma, sigma_f, atol=5e-2, rtol=5e-2), "sigma mismatch (f32 ref)"
    assert jnp.all(sigma >= 0.0)

    print("KERNEL_OK")
</pallas_src>

<mosaic_0001>
module attributes {stable_mosaic.version = 11 : i64} {
  func.func @expert_kernel(%arg0: i32, %arg1: memref<16x32xbf16, #tpu.memory_space<vmem>>, %arg2: memref<32x512xbf16, #tpu.memory_space<vmem>>, %arg3: memref<1x512xf32, #tpu.memory_space<vmem>>, %arg4: memref<512x256xbf16, #tpu.memory_space<vmem>>, %arg5: memref<1x256xf32, #tpu.memory_space<vmem>>, %arg6: memref<256x128xbf16, #tpu.memory_space<vmem>>, %arg7: memref<1x128xf32, #tpu.memory_space<vmem>>, %arg8: memref<128x128xbf16, #tpu.memory_space<vmem>>, %arg9: memref<1x128xf32, #tpu.memory_space<vmem>>, %arg10: memref<16x128xf32, #tpu.memory_space<vmem>>) attributes {dimension_semantics = [#tpu.dimension_semantics<parallel>], iteration_bounds = array<i64: 1>, scalar_prefetch = 0 : i64, scratch_operands = 0 : i64, tpu.core_type = #tpu.core_type<tc>, window_params = [{transform_indices = @transform_0, window_bounds = array<i64: 16, 32>}, {pipeline_mode = #tpu.pipeline_mode<synchronous>, transform_indices = @transform_1, window_bounds = array<i64: 32, 512>}, {pipeline_mode = #tpu.pipeline_mode<synchronous>, transform_indices = @transform_2, window_bounds = array<i64: 1, 512>}, {pipeline_mode = #tpu.pipeline_mode<synchronous>, transform_indices = @transform_3, window_bounds = array<i64: 512, 256>}, {pipeline_mode = #tpu.pipeline_mode<synchronous>, transform_indices = @transform_4, window_bounds = array<i64: 1, 256>}, {pipeline_mode = #tpu.pipeline_mode<synchronous>, transform_indices = @transform_5, window_bounds = array<i64: 256, 128>}, {pipeline_mode = #tpu.pipeline_mode<synchronous>, transform_indices = @transform_6, window_bounds = array<i64: 1, 128>}, {pipeline_mode = #tpu.pipeline_mode<synchronous>, transform_indices = @transform_7, window_bounds = array<i64: 128, 128>}, {pipeline_mode = #tpu.pipeline_mode<synchronous>, transform_indices = @transform_8, window_bounds = array<i64: 1, 128>}, {transform_indices = @transform_9, window_bounds = array<i64: 16, 128>}]} {
    %c0 = arith.constant 0 : index
    %c0_0 = arith.constant 0 : index
    %0 = vector.load %arg1[%c0, %c0_0] : memref<16x32xbf16, #tpu.memory_space<vmem>>, vector<16x32xbf16>
    %c0_1 = arith.constant 0 : index
    %c0_2 = arith.constant 0 : index
    %1 = vector.load %arg2[%c0_1, %c0_2] : memref<32x512xbf16, #tpu.memory_space<vmem>>, vector<32x512xbf16>
    %cst = arith.constant dense<0.000000e+00> : vector<16x512xf32>
    %2 = tpu.matmul %0, %1, %cst {dimension_numbers = #tpu.dot_dimension_numbers<[1], [0], [0], [1], [0, 0, 1, 1], [], []>} : vector<16x32xbf16>, vector<32x512xbf16>, vector<16x512xf32> -> vector<16x512xf32>
    %c0_3 = arith.constant 0 : index
    %c0_4 = arith.constant 0 : index
    %3 = vector.load %arg3[%c0_3, %c0_4] : memref<1x512xf32, #tpu.memory_space<vmem>>, vector<1x512xf32>
    %4 = vector.broadcast %3 : vector<1x512xf32> to vector<16x512xf32>
    %5 = arith.addf %2, %4 : vector<16x512xf32>
    %6 = math.tanh %5 : vector<16x512xf32>
    %7 = arith.truncf %6 : vector<16x512xf32> to vector<16x512xbf16>
    %c0_5 = arith.constant 0 : index
    %c0_6 = arith.constant 0 : index
    %8 = vector.load %arg4[%c0_5, %c0_6] : memref<512x256xbf16, #tpu.memory_space<vmem>>, vector<512x256xbf16>
    %cst_7 = arith.constant dense<0.000000e+00> : vector<16x256xf32>
    %9 = tpu.matmul %7, %8, %cst_7 {dimension_numbers = #tpu.dot_dimension_numbers<[1], [0], [0], [1], [0, 0, 1, 1], [], []>} : vector<16x512xbf16>, vector<512x256xbf16>, vector<16x256xf32> -> vector<16x256xf32>
    %c0_8 = arith.constant 0 : index
    %c0_9 = arith.constant 0 : index
    %10 = vector.load %arg5[%c0_8, %c0_9] : memref<1x256xf32, #tpu.memory_space<vmem>>, vector<1x256xf32>
    %11 = vector.broadcast %10 : vector<1x256xf32> to vector<16x256xf32>
    %12 = arith.addf %9, %11 : vector<16x256xf32>
    %13 = math.tanh %12 : vector<16x256xf32>
    %14 = arith.truncf %13 : vector<16x256xf32> to vector<16x256xbf16>
    %c0_10 = arith.constant 0 : index
    %c0_11 = arith.constant 0 : index
    %15 = vector.load %arg6[%c0_10, %c0_11] : memref<256x128xbf16, #tpu.memory_space<vmem>>, vector<256x128xbf16>
    %cst_12 = arith.constant dense<0.000000e+00> : vector<16x128xf32>
    %16 = tpu.matmul %14, %15, %cst_12 {dimension_numbers = #tpu.dot_dimension_numbers<[1], [0], [0], [1], [0, 0, 1, 1], [], []>} : vector<16x256xbf16>, vector<256x128xbf16>, vector<16x128xf32> -> vector<16x128xf32>
    %c0_13 = arith.constant 0 : index
    %c0_14 = arith.constant 0 : index
    %17 = vector.load %arg7[%c0_13, %c0_14] : memref<1x128xf32, #tpu.memory_space<vmem>>, vector<1x128xf32>
    %18 = vector.broadcast %17 : vector<1x128xf32> to vector<16x128xf32>
    %19 = arith.addf %16, %18 : vector<16x128xf32>
    %20 = math.tanh %19 : vector<16x128xf32>
    %21 = arith.truncf %20 : vector<16x128xf32> to vector<16x128xbf16>
    %c0_15 = arith.constant 0 : index
    %c0_16 = arith.constant 0 : index
    %22 = vector.load %arg8[%c0_15, %c0_16] : memref<128x128xbf16, #tpu.memory_space<vmem>>, vector<128x128xbf16>
    %cst_17 = arith.constant dense<0.000000e+00> : vector<16x128xf32>
    %23 = tpu.matmul %21, %22, %cst_17 {dimension_numbers = #tpu.dot_dimension_numbers<[1], [0], [0], [1], [0, 0, 1, 1], [], []>} : vector<16x128xbf16>, vector<128x128xbf16>, vector<16x128xf32> -> vector<16x128xf32>
    %c0_18 = arith.constant 0 : index
    %c0_19 = arith.constant 0 : index
    %24 = vector.load %arg9[%c0_18, %c0_19] : memref<1x128xf32, #tpu.memory_space<vmem>>, vector<1x128xf32>
    %25 = vector.broadcast %24 : vector<1x128xf32> to vector<16x128xf32>
    %26 = arith.addf %23, %25 : vector<16x128xf32>
    %27 = tpu.iota {dimensions = array<i32: 1>} : vector<16x128xi32>
    %c8_i32 = arith.constant 8 : i32
    %28 = vector.broadcast %c8_i32 : i32 to vector<16x128xi32>
    %29 = arith.cmpi sge, %27, %28 : vector<16x128xi32>
    %c16_i32 = arith.constant 16 : i32
    %30 = vector.broadcast %c16_i32 : i32 to vector<16x128xi32>
    %31 = arith.cmpi slt, %27, %30 : vector<16x128xi32>
    %32 = arith.andi %29, %31 : vector<16x128xi1>
    %cst_20 = arith.constant 2.000000e+01 : f32
    %33 = vector.broadcast %cst_20 : f32 to vector<16x128xf32>
    %34 = arith.cmpf ogt, %26, %33 : vector<16x128xf32>
    %cst_21 = arith.constant 2.000000e+01 : f32
    %35 = vector.broadcast %cst_21 : f32 to vector<16x128xf32>
    %36 = arith.minimumf %26, %35 : vector<16x128xf32>
    %37 = math.exp %36 : vector<16x128xf32>
    %cst_22 = arith.constant 1.000000e+00 : f32
    %38 = vector.broadcast %cst_22 : f32 to vector<16x128xf32>
    %39 = arith.addf %38, %37 : vector<16x128xf32>
    %40 = math.log %39 : vector<16x128xf32>
    %41 = arith.select %34, %26, %40 : vector<16x128xi1>, vector<16x128xf32>
    %42 = arith.select %32, %41, %26 : vector<16x128xi1>, vector<16x128xf32>
    %c0_23 = arith.constant 0 : index
    %c0_24 = arith.constant 0 : index
    %43 = vector.load %arg10[%c0_23, %c0_24] : memref<16x128xf32, #tpu.memory_space<vmem>>, vector<16x128xf32>
    tpu.vector_store %arg10[%c0_23, %c0_24], %42 {strides = array<i32>} : memref<16x128xf32, #tpu.memory_space<vmem>>, vector<16x128xf32>,
    return
  }
  func.func @transform_0(%arg0: i32) -> (i32, i32) {
    %c0_i32 = arith.constant 0 : i32
    %c0_i32_0 = arith.constant 0 : i32
    return %arg0, %c0_i32 : i32, i32
  }
  func.func @transform_1(%arg0: i32) -> (i32, i32) {
    %c0_i32 = arith.constant 0 : i32
    %c0_i32_0 = arith.constant 0 : i32
    %c0_i32_1 = arith.constant 0 : i32
    return %c0_i32, %c0_i32_0 : i32, i32
  }
  func.func @transform_2(%arg0: i32) -> (i32, i32) {
    %c0_i32 = arith.constant 0 : i32
    %c0_i32_0 = arith.constant 0 : i32
    %c0_i32_1 = arith.constant 0 : i32
    return %c0_i32, %c0_i32_0 : i32, i32
  }
  func.func @transform_3(%arg0: i32) -> (i32, i32) {
    %c0_i32 = arith.constant 0 : i32
    %c0_i32_0 = arith.constant 0 : i32
    %c0_i32_1 = arith.constant 0 : i32
    return %c0_i32, %c0_i32_0 : i32, i32
  }
  func.func @transform_4(%arg0: i32) -> (i32, i32) {
    %c0_i32 = arith.constant 0 : i32
    %c0_i32_0 = arith.constant 0 : i32
    %c0_i32_1 = arith.constant 0 : i32
    return %c0_i32, %c0_i32_0 : i32, i32
  }
  func.func @transform_5(%arg0: i32) -> (i32, i32) {
    %c0_i32 = arith.constant 0 : i32
    %c0_i32_0 = arith.constant 0 : i32
    %c0_i32_1 = arith.constant 0 : i32
    return %c0_i32, %c0_i32_0 : i32, i32
  }
  func.func @transform_6(%arg0: i32) -> (i32, i32) {
    %c0_i32 = arith.constant 0 : i32
    %c0_i32_0 = arith.constant 0 : i32
    %c0_i32_1 = arith.constant 0 : i32
    return %c0_i32, %c0_i32_0 : i32, i32
  }
  func.func @transform_7(%arg0: i32) -> (i32, i32) {
    %c0_i32 = arith.constant 0 : i32
    %c0_i32_0 = arith.constant 0 : i32
    %c0_i32_1 = arith.constant 0 : i32
    return %c0_i32, %c0_i32_0 : i32, i32
  }
  func.func @transform_8(%arg0: i32) -> (i32, i32) {
    %c0_i32 = arith.constant 0 : i32
    %c0_i32_0 = arith.constant 0 : i32
    %c0_i32_1 = arith.constant 0 : i32
    return %c0_i32, %c0_i32_0 : i32, i32
  }
  func.func @transform_9(%arg0: i32) -> (i32, i32) {
    %c0_i32 = arith.constant 0 : i32
    %c0_i32_0 = arith.constant 0 : i32
    return %arg0, %c0_i32 : i32, i32
  }
}

</mosaic_0001>

<bundles_post_ra>
// kernel: tpu_custom_call.1
= control target key start
LH: loop header
LB: loop body
LE: loop exit
PB: predicated region body
PF: predicated region fallthrough
CT: control target
= control target key end

     0   :  { %14 = vsyncpa [#allocation3], 0  ;;  %s1773_s0 = inlined_call_operand.hbm [shape: bf16[16,32], index: 0, kind: input, shape index: {}]   ;;  %s1774_s1 = inlined_call_operand.hbm [shape: bf16[32,512], index: 1, kind: input, shape index: {}]   ;;  %s1775_s2 = inlined_call_operand.vmem [shape: f32[1,512], index: 2, kind: input, shape index: {}]   ;;  %s1776_s3 = inlined_call_operand.hbm [shape: bf16[512,256], index: 3, kind: input, shape index: {}]   ;;  %s1777_s4 = inlined_call_operand.vmem [shape: f32[1,256], index: 4, kind: input, shape index: {}]   ;;  %s1778_s5 = inlined_call_operand.hbm [shape: bf16[256,128], index: 5, kind: input, shape index: {}]   ;;  %s1779_s6 = inlined_call_operand.vmem [shape: f32[1,128], index: 6, kind: input, shape index: {}]   ;;  %s1780_s7 = inlined_call_operand.hbm [shape: bf16[128,128], index: 7, kind: input, shape index: {}]   ;;  %s1781_s8 = inlined_call_operand.vmem [shape: f32[1,128], index: 8, kind: input, shape index: {}]   ;;  %s1782_s9 = inlined_call_operand.hbm [shape: f32[16,128], index: 9, kind: output, shape index: {}]  }
   0x1   :  { %15 = vsyncpa [#allocation6], 0 }
   0x2   :  { %16 = vsyncpa [#allocation9], 0 }
   0x3   :  { %17 = vsyncpa [#allocation4], 0  ;;  %s1588_s30 = smov [#allocation5]   ;;  %s1448_s13 = scalar_lea.hbm %s1774_s1, 1024 }
   0x4   :  { %s35_s10 = sshll.u32 %s1588_s30, 4  ;;  %p1449_p0 = scmp.ne.s32.totalorder %s1774_s1, %s1448_s13  ;;  %s36_s10 = int_to_ptr.vmem [resolvable:$true] %s35_s10 }
   0x5   :  { %p1452_p1 = scmp.lt.u32.totalorder %s1448_s13, %s1774_s1 }
   0x7   :  { %p1454_p2 = pnand %p1452_p1, %p1449_p0 }
   0x9   :  { %1457 = shalt.err (!%p1454_p2)
}
   0xa   :  { %s1458_s18 = scalar_lea.vmem %s36_s10, 1024  ;;  %p1463_p4 = scmp.lt.s32.totalorder %s36_s10, %s36_s10 }
   0xb   :  { %p1459_p3 = scmp.ne.s32.totalorder %s36_s10, %s1458_s18  ;;  %p1464_p5 = scmp.lt.s32.totalorder %s1458_s18, %s1458_s18 }
   0xd   :  { %p1465_p6 = por %p1464_p5, %p1463_p4 }
   0xf   :  { %p1466_p7 = pnand %p1465_p6, %p1459_p3 }
  0x11   :  { %1469 = shalt.err (!%p1466_p7)
}
  0x12   :  { %s1589_s19 = smov 256   ;;  %s1590_s20 = smov 16  }
  0x13   :  { %41 = dma.hbm_to_vmem [thread:$0]  %s1774_s1, 1024, %s36_s10, [#allocation6], %s1589_s19, %s1589_s19, %s1590_s20  }
  0x14   :  { %s1591_s23 = smov [#allocation8]   ;;  %s1592_s25 = smov [#allocation2]  }
  0x15   :  { %s63_s24 = sshll.u32 %s1591_s23, 4  ;;  %s23_s26 = sshll.u32 %s1592_s25, 4  ;;  %s64_s24 = int_to_ptr.vmem [resolvable:$true] %s63_s24  ;;  %s24_s26 = int_to_ptr.vmem [resolvable:$true] %s23_s26 }
  0x16   :  { %s1470_s29 = scalar_lea.hbm %s1778_s5, 2048 }
  0x17   :  { %p1471_p8 = scmp.ne.s32.totalorder %s1778_s5, %s1470_s29  ;;  %p1474_p9 = scmp.lt.u32.totalorder %s1470_s29, %s1778_s5 }
  0x19   :  { %p1476_p10 = pnand %p1474_p9, %p1471_p8 }
  0x1b   :  { %1479 = shalt.err (!%p1476_p10)
}
  0x1c   :  { %s1480_s1 = scalar_lea.vmem %s64_s24, 2048  ;;  %p1485_p12 = scmp.lt.s32.totalorder %s64_s24, %s64_s24 }
  0x1d   :  { %p1481_p11 = scmp.ne.s32.totalorder %s64_s24, %s1480_s1  ;;  %p1486_p13 = scmp.lt.s32.totalorder %s1480_s1, %s1480_s1 }
  0x1f   :  { %p1487_p0 = por %p1486_p13, %p1485_p12 }
  0x21   :  { %p1488_p1 = pnand %p1487_p0, %p1481_p11 }
  0x23   :  { %1491 = shalt.err (!%p1488_p1)
}
  0x24   :  { %s1593_s10 = smov 64   ;;  %s1594_s14 = smov 4  }
  0x25   :  { %69 = dma.hbm_to_vmem [thread:$0]  %s1778_s5, 2048, %s64_s24, [#allocation9], %s1593_s10, %s1593_s10, %s1594_s14  }
  0x26   :  { %s1492_s19 = scalar_lea.hbm %s1773_s0, 128 }
  0x27   :  { %p1493_p2 = scmp.ne.s32.totalorder %s1773_s0, %s1492_s19  ;;  %p1496_p3 = scmp.lt.u32.totalorder %s1492_s19, %s1773_s0 }
  0x29   :  { %p1498_p4 = pnand %p1496_p3, %p1493_p2 }
  0x2b   :  { %1501 = shalt.err (!%p1498_p4)
}
  0x2c   :  { %s1502_s25 = scalar_lea.vmem %s24_s26, 128  ;;  %p1507_p6 = scmp.lt.s32.totalorder %s24_s26, %s24_s26 }
  0x2d   :  { %p1503_p5 = scmp.ne.s32.totalorder %s24_s26, %s1502_s25  ;;  %p1508_p7 = scmp.lt.s32.totalorder %s1502_s25, %s1502_s25 }
  0x2f   :  { %p1509_p8 = por %p1508_p7, %p1507_p6 }
  0x31   :  { %p1510_p9 = pnand %p1509_p8, %p1503_p5 }
  0x33   :  { %1513 = shalt.err (!%p1510_p9)
}
  0x34   :  { %29 = dma.hbm_to_vmem [thread:$0]  %s1773_s0, 128, %s24_s26, [#allocation3], %s1593_s10, %s1593_s10, %s1594_s14  }
  0x35   :  { %s1595_s27 = smov [#allocation7]   ;;  %s1514_s11 = scalar_lea.hbm %s1776_s3, 8192 }
  0x36   :  { %s49_s28 = sshll.u32 %s1595_s27, 4  ;;  %p1515_p10 = scmp.ne.s32.totalorder %s1776_s3, %s1514_s11  ;;  %s50_s28 = int_to_ptr.vmem [resolvable:$true] %s49_s28 }
  0x37   :  { %p1518_p11 = scmp.lt.u32.totalorder %s1514_s11, %s1776_s3 }
  0x39   :  { %p1520_p12 = pnand %p1518_p11, %p1515_p10 }
  0x3b   :  { %1523 = shalt.err (!%p1520_p12)
}
  0x3c   :  { %s1524_s16 = scalar_lea.vmem %s50_s28, 8192  ;;  %p1529_p0 = scmp.lt.s32.totalorder %s50_s28, %s50_s28 }
  0x3d   :  { %p1525_p13 = scmp.ne.s32.totalorder %s50_s28, %s1524_s16  ;;  %p1530_p1 = scmp.lt.s32.totalorder %s1524_s16, %s1524_s16 }
  0x3f   :  { %p1531_p2 = por %p1530_p1, %p1529_p0 }
  0x41   :  { %p1532_p3 = pnand %p1531_p2, %p1525_p13 }
  0x43   :  { %1535 = shalt.err (!%p1532_p3)
}
  0x44   :  { %s1596_s0 = smov 128   ;;  %s1597_s26 = smov 8  }
  0x45   :  { %55 = dma.hbm_to_vmem [thread:$0]  %s1776_s3, 8192, %s50_s28, [#allocation6], %s1596_s0, %s1596_s0, %s1597_s26  }
  0x46   :  { %s1598_s19 = smov [#allocation10]   ;;  %s1536_s23 = scalar_lea.hbm %s1780_s7, 1024 }
  0x47   :  { %s77_s20 = sshll.u32 %s1598_s19, 4  ;;  %p1537_p4 = scmp.ne.s32.totalorder %s1780_s7, %s1536_s23  ;;  %s78_s20 = int_to_ptr.vmem [resolvable:$true] %s77_s20 }
  0x48   :  { %p1540_p5 = scmp.lt.u32.totalorder %s1536_s23, %s1780_s7 }
  0x4a   :  { %p1542_p6 = pnand %p1540_p5, %p1537_p4 }
  0x4c   :  { %1545 = shalt.err (!%p1542_p6)
}
  0x4d   :  { %s1546_s29 = scalar_lea.vmem %s78_s20, 1024  ;;  %p1551_p8 = scmp.lt.s32.totalorder %s78_s20, %s78_s20 }
  0x4e   :  { %p1547_p7 = scmp.ne.s32.totalorder %s78_s20, %s1546_s29  ;;  %p1552_p9 = scmp.lt.s32.totalorder %s1546_s29, %s1546_s29 }
  0x50   :  { %p1553_p10 = por %p1552_p9, %p1551_p8 }
  0x52   :  { %p1554_p11 = pnand %p1553_p10, %p1547_p7 }
  0x54   :  { %1557 = shalt.err (!%p1554_p11)
}
  0x55   :  { %83 = dma.hbm_to_vmem [thread:$0]  %s1780_s7, 1024, %s78_s20, [#allocation9], %s1593_s10, %s1593_s10, %s1594_s14  }
  0x56   :  { %1580 = dma.done.wait [#allocation3], 128  }
  0x57   :  { %1581 = vsyncadd [#allocation3], 4294967168 }
  0x58   :  { %1582 = dma.done.wait [#allocation6], 9216  }
  0x59   :  { %1583 = vsyncadd [#allocation6], 4294958080 }
  0x5a   :  { %1584 = dma.done.wait [#allocation9], 3072  }
  0x5b   :  { %1585 = vsyncadd [#allocation9], 4294964224  ;;  %v1599_v0 = vmov 0   ;;  %v1279_v1 = vld [vmem:[#allocation5 + $0x4] ss:$16 sps:$4 sm:$0xff]   ;;  %v1285_v6 = vld [vmem:[#allocation2] sm:$0xff]   ;;  %v114_v49 = vlaneseq }
  0x5c   :  { %215 = vmatprep.mubr.bf16.mxu1 %v1599_v0  ;;  %v1281_v2 = vld [vmem:[#allocation5] ss:$16 sps:$4 sm:$0xff]   ;;  %183 = vmatprep.subr.bf16.mxu1 %v1279_v1  ;;  %v1282_v3 = vld [vmem:[#allocation5 + $0x24] ss:$16 sps:$4 sm:$0xff]   ;;  %v1288_v5 = vld [vmem:[#allocation5 + $0xc] ss:$16 sps:$4 sm:$0xff]  }
  0x5d   :  { %184 = vmatpush1.bf16.msra.mxu1 %v1281_v2  ;;  %v1284_v4 = vld [vmem:[#allocation5 + $0x20] ss:$16 sps:$4 sm:$0xff]   ;;  %v1286_v7 = vld [vmem:[#allocation5 + $0x8] ss:$16 sps:$4 sm:$0xff]   ;;  %vm179_vm0 = vcmask 261120   ;;  %v1728_v50 = vshrl.u32 %v114_v49, 7 }
  0x5e   :  { %185 = vmatprep.subr.bf16.mxu1 %v1282_v3  ;;  %v1292_v8 = vld [vmem:[#allocation7 + $0x4] ss:$8 sps:$4 sm:$0xff]   ;;  %v1294_v9 = vld [vmem:[#allocation7] ss:$8 sps:$4 sm:$0xff]   ;;  %v1295_v11 = vld [vmem:[#allocation7 + $0x14] ss:$8 sps:$4 sm:$0xff]  }
  0x5f   :  { %v1291_v10 = vld [vmem:[#allocation5 + $0x2c] ss:$16 sps:$4 sm:$0xff]   ;;  %677 = vmatprep.subr.bf16.mxu0 %v1292_v8  ;;  %v1297_v12 = vld [vmem:[#allocation7 + $0x10] ss:$8 sps:$4 sm:$0xff]   ;;  %v1300_v15 = vld [vmem:[#allocation7 + $0x20] ss:$8 sps:$4 sm:$0xff]  }
  0x60   :  { %678 = vmatpush1.bf16.msra.mxu0 %v1294_v9  ;;  %v1289_v13 = vld [vmem:[#allocation5 + $0x28] ss:$16 sps:$4 sm:$0xff]   ;;  %v1298_v14 = vld [vmem:[#allocation7 + $0x24] ss:$8 sps:$4 sm:$0xff]   ;;  %v1301_v16 = vld [vmem:[#allocation7 + $0x34] ss:$8 sps:$4 sm:$0xff]  }
  0x61   :  { %186 = vmatpush1.bf16.msra.mxu1 %v1284_v4  ;;  %679 = vmatprep.subr.bf16.mxu0 %v1295_v11  ;;  %v1303_v17 = vld [vmem:[#allocation7 + $0x30] ss:$8 sps:$4 sm:$0xff]   ;;  %v1304_v18 = vld [vmem:[#allocation7 + $0x44] ss:$8 sps:$4 sm:$0xff]   ;;  %v1306_v19 = vld [vmem:[#allocation7 + $0x40] ss:$8 sps:$4 sm:$0xff]  }
  0x62   :  { %226 = vmatprep.subr.bf16.mxu1 %v1288_v5  ;;  %v1307_v20 = vld [vmem:[#allocation7 + $0x54] ss:$8 sps:$4 sm:$0xff]   ;;  %v1309_v21 = vld [vmem:[#allocation7 + $0x50] ss:$8 sps:$4 sm:$0xff]   ;;  %v1310_v22 = vld [vmem:[#allocation7 + $0x64] ss:$8 sps:$4 sm:$0xff]  }
  0x63   :  { %v1312_v23 = vld [vmem:[#allocation7 + $0x60] ss:$8 sps:$4 sm:$0xff]   ;;  %v1313_v24 = vld [vmem:[#allocation7 + $0x74] ss:$8 sps:$4 sm:$0xff]   ;;  %v1315_v25 = vld [vmem:[#allocation7 + $0x70] ss:$8 sps:$4 sm:$0xff]  }
  0x64   :  { %1113 = vmatmul.mubr.msk.bf16.vlgmr.msra.gmra.mrb[0].mxu1 %vm179_vm0, %v1285_v6  ;;  %680 = vmatpush1.bf16.msra.mxu0 %v1297_v12  ;;  %v1316_v26 = vld [vmem:[#allocation7 + $0x84] ss:$8 sps:$4 sm:$0xff]   ;;  %v1318_v27 = vld [vmem:[#allocation7 + $0x80] ss:$8 sps:$4 sm:$0xff]   ;;  %v1319_v28 = vld [vmem:[#allocation7 + $0x94] ss:$8 sps:$4 sm:$0xff]  }
  0x65   :  { %227 = vmatpush1.bf16.msra.mxu1 %v1286_v7  ;;  %258 = vmatprep.mubr.bf16.mxu1 %v1599_v0  ;;  %v1321_v29 = vld [vmem:[#allocation7 + $0x90] ss:$8 sps:$4 sm:$0xff]   ;;  %v1322_v30 = vld [vmem:[#allocation7 + $0xa4] ss:$8 sps:$4 sm:$0xff]   ;;  %v1324_v31 = vld [vmem:[#allocation7 + $0xa0] ss:$8 sps:$4 sm:$0xff]  }
  0x66   :  { %228 = vmatprep.subr.bf16.mxu1 %v1291_v10  ;;  %681 = vmatprep.subr.bf16.mxu0 %v1298_v14  ;;  %v1325_v32 = vld [vmem:[#allocation7 + $0xb4] ss:$8 sps:$4 sm:$0xff]   ;;  %v1327_v33 = vld [vmem:[#allocation7 + $0xb0] ss:$8 sps:$4 sm:$0xff]   ;;  %v1328_v34 = vld [vmem:[#allocation7 + $0xc4] ss:$8 sps:$4 sm:$0xff]  }
  0x67   :  { %v1330_v35 = vld [vmem:[#allocation7 + $0xc0] ss:$8 sps:$4 sm:$0xff]   ;;  %v1331_v36 = vld [vmem:[#allocation7 + $0xd4] ss:$8 sps:$4 sm:$0xff]   ;;  %v1333_v37 = vld [vmem:[#allocation7 + $0xd0] ss:$8 sps:$4 sm:$0xff]  }
  0x68   :  { %682 = vmatpush1.bf16.msra.mxu0 %v1300_v15  ;;  %v1334_v38 = vld [vmem:[#allocation7 + $0xe4] ss:$8 sps:$4 sm:$0xff]   ;;  %v1336_v39 = vld [vmem:[#allocation7 + $0xe0] ss:$8 sps:$4 sm:$0xff]   ;;  %v1337_v40 = vld [vmem:[#allocation7 + $0xf4] ss:$8 sps:$4 sm:$0xff]  }
  0x69   :  { %229 = vmatpush1.bf16.msra.mxu1 %v1289_v13  ;;  %683 = vmatprep.subr.bf16.mxu0 %v1301_v16  ;;  %v1339_v41 = vld [vmem:[#allocation7 + $0xf0] ss:$8 sps:$4 sm:$0xff]   ;;  %v1342_v42 = vld [vmem:[#allocation7 + $0x104] ss:$8 sps:$4 sm:$0xff]   ;;  %v116_v51 = vsub.s32 0, %v1728_v50  ;;  %v120_v53 = vsub.s32 1, %v1728_v50 }
  0x6a   :  { %v1388_v43 = vld [vmem:[#allocation8 + $0x40] sm:$0xff]   ;;  %v1390_v45 = vld [vmem:[#allocation8 + $0x48] sm:$0xff]   ;;  %v1392_v47 = vld [vmem:[#allocation8 + $0x50] sm:$0xff]   ;;  %v124_v59 = vsub.s32 2, %v1728_v50  ;;  %v128_v62 = vsub.s32 3, %v1728_v50  ;;  %vm1601_vm1 = vmmov 0  }
  0x6b   :  { %v1389_v44 = vld [vmem:[#allocation8] sm:$0xff]   ;;  %1205 = vmatprep.subr.bf16.mxu1 %v1388_v43  ;;  %v1391_v46 = vld [vmem:[#allocation8 + $0x8] sm:$0xff]   ;;  %v1393_v48 = vld [vmem:[#allocation8 + $0x10] sm:$0xff]  }
  0x6c   :  { %1114 = vmatmul.mubr.msk.bf16.vlgmr.msra.gmra.mrb[4].mxu1 %vm179_vm0, %v1285_v6  ;;  %684 = vmatpush1.bf16.msra.mxu0 %v1303_v17  ;;  %v112_v52 = vld [vmem:[%s1775_s2] sm:$0xf]  ;;  %v1372_v43 = vld [vmem:[#allocation7 + $0x1a4] ss:$8 sps:$4 sm:$0xff]  }
  0x6d   :  { %685 = vmatprep.subr.bf16.mxu0 %v1304_v18  ;;  %1206 = vmatpush3.bf16.msra.mxu1 %v1389_v44  ;;  %v117_v54 = vrot.slane %v112_v52, %v116_v51  ;;  %v121_v55 = vrot.slane %v112_v52, %v120_v53  ;;  %v125_v2 = vrot.slane %v112_v52, %v124_v59  ;;  %v1340_v18 = vld [vmem:[#allocation7 + $0x100] ss:$8 sps:$4 sm:$0xff]   ;;  %v1394_v59 = vld [vmem:[#allocation8 + $0x58] sm:$0xff]  }
  0x6e   :  { %1207 = vmatprep.subr.bf16.mxu1 %v1390_v45  ;;  %v129_v3 = vrot.slane %v112_v52, %v128_v62  ;;  %v1370_v44 = vld [vmem:[#allocation7 + $0x1a0] ss:$8 sps:$4 sm:$0xff]   ;;  %v1375_v45 = vld [vmem:[#allocation7 + $0x1b4] ss:$8 sps:$4 sm:$0xff]  }
  0x6f   :  { %v1381_v52 = vld [vmem:[#allocation7 + $0x1d4] ss:$8 sps:$4 sm:$0xff]   ;;  %v1397_v62 = vld [vmem:[#allocation8 + $0x20] sm:$0xff]  }
  0x70   :  { %686 = vmatpush1.bf16.msra.mxu0 %v1306_v19  ;;  %v1345_v19 = vld [vmem:[#allocation7 + $0x114] ss:$8 sps:$4 sm:$0xff]   ;;  %v1404_v50 = vld [vmem:[#allocation10] sm:$0xff]  }
  0x71   :  { %687 = vmatprep.subr.bf16.mxu0 %v1307_v20  ;;  %1208 = vmatpush3.bf16.msra.mxu1 %v1391_v46  ;;  %v1373_v46 = vld [vmem:[#allocation7 + $0x1b0] ss:$8 sps:$4 sm:$0xff]  }
  0x72   :  { %1209 = vmatprep.subr.bf16.mxu1 %v1392_v47  ;;  %v1378_v47 = vld [vmem:[#allocation7 + $0x1c4] ss:$8 sps:$4 sm:$0xff]  }
  0x74   :  { %688 = vmatpush1.bf16.msra.mxu0 %v1309_v21  ;;  %v1343_v21 = vld [vmem:[#allocation7 + $0x110] ss:$8 sps:$4 sm:$0xff]  }
  0x75   :  { %689 = vmatprep.subr.bf16.mxu0 %v1310_v22  ;;  %1210 = vmatpush3.bf16.msra.mxu1 %v1393_v48  ;;  %v1376_v48 = vld [vmem:[#allocation7 + $0x1c0] ss:$8 sps:$4 sm:$0xff]  }
  0x76   :  { %1211 = vmatprep.subr.bf16.mxu1 %v1394_v59  ;;  %v1061_v59 = vand.u32 127, %v114_v49 }
  0x78   :  { %690 = vmatpush1.bf16.msra.mxu0 %v1312_v23  ;;  %v1348_v23 = vld [vmem:[#allocation7 + $0x124] ss:$8 sps:$4 sm:$0xff]   ;;  %vm1062_vm2 = vcmp.ge.s32.totalorder %v1061_v59, 8  ;;  %vm1063_vm3 = vcmp.lt.s32.totalorder %v1061_v59, 16 }
  0x79   :  { %691 = vmatprep.subr.bf16.mxu0 %v1313_v24  ;;  %vm1064_vm4 = vmand %vm1062_vm2, %vm1063_vm3 }
  0x7c   :  { %692 = vmatpush1.bf16.msra.mxu0 %v1315_v25 }
  0x7d   :  { %693 = vmatprep.subr.bf16.mxu0 %v1316_v26 }
  0x80   :  { %694 = vmatpush1.bf16.msra.mxu0 %v1318_v27  ;;  %v1346_v27 = vld [vmem:[#allocation7 + $0x120] ss:$8 sps:$4 sm:$0xff]  }
  0x81   :  { %695 = vmatprep.subr.bf16.mxu0 %v1319_v28 }
  0x84   :  { %696 = vmatpush1.bf16.msra.mxu0 %v1321_v29  ;;  %v1351_v29 = vld [vmem:[#allocation7 + $0x134] ss:$8 sps:$4 sm:$0xff]  }
  0x85   :  { %697 = vmatprep.subr.bf16.mxu0 %v1322_v30  ;;  %v1349_v30 = vld [vmem:[#allocation7 + $0x130] ss:$8 sps:$4 sm:$0xff]  }
  0x88   :  { %698 = vmatpush1.bf16.msra.mxu0 %v1324_v31  ;;  %v1354_v31 = vld [vmem:[#allocation7 + $0x144] ss:$8 sps:$4 sm:$0xff]  }
  0x89   :  { %699 = vmatprep.subr.bf16.mxu0 %v1325_v32  ;;  %v1352_v32 = vld [vmem:[#allocation7 + $0x140] ss:$8 sps:$4 sm:$0xff]  }
  0x8c   :  { %700 = vmatpush1.bf16.msra.mxu0 %v1327_v33  ;;  %v1357_v33 = vld [vmem:[#allocation7 + $0x154] ss:$8 sps:$4 sm:$0xff]  }
  0x8d   :  { %701 = vmatprep.subr.bf16.mxu0 %v1328_v34  ;;  %v1355_v34 = vld [vmem:[#allocation7 + $0x150] ss:$8 sps:$4 sm:$0xff]  }
  0x90   :  { %702 = vmatpush1.bf16.msra.mxu0 %v1330_v35  ;;  %v1360_v35 = vld [vmem:[#allocation7 + $0x164] ss:$8 sps:$4 sm:$0xff]  }
  0x91   :  { %703 = vmatprep.subr.bf16.mxu0 %v1331_v36  ;;  %v1358_v36 = vld [vmem:[#allocation7 + $0x160] ss:$8 sps:$4 sm:$0xff]  }
  0x94   :  { %704 = vmatpush1.bf16.msra.mxu0 %v1333_v37  ;;  %v1363_v37 = vld [vmem:[#allocation7 + $0x174] ss:$8 sps:$4 sm:$0xff]  }
  0x95   :  { %705 = vmatprep.subr.bf16.mxu0 %v1334_v38  ;;  %v1361_v38 = vld [vmem:[#allocation7 + $0x170] ss:$8 sps:$4 sm:$0xff]  }
  0x98   :  { %706 = vmatpush1.bf16.msra.mxu0 %v1336_v39  ;;  %v1366_v39 = vld [vmem:[#allocation7 + $0x184] ss:$8 sps:$4 sm:$0xff]  }
  0x99   :  { %707 = vmatprep.subr.bf16.mxu0 %v1337_v40  ;;  %v1364_v40 = vld [vmem:[#allocation7 + $0x180] ss:$8 sps:$4 sm:$0xff]  }
  0x9c   :  { %708 = vmatpush1.bf16.msra.mxu0 %v1339_v41  ;;  %v1369_v41 = vld [vmem:[#allocation7 + $0x194] ss:$8 sps:$4 sm:$0xff]  }
  0x9d   :  { %720 = vmatprep.subr.bf16.mxu0 %v1342_v42  ;;  %v1367_v42 = vld [vmem:[#allocation7 + $0x190] ss:$8 sps:$4 sm:$0xff]  }
 0x137   :  { %v217_v56 = vpop.f32.mrb[0].mxu1 }
 0x138   :  { %v218_v57 = vadd.f32 %v217_v56, %v117_v54  ;;  %v219_v58 = vpop.f32.mrb[1].mxu1  ;;  %v1382_v56 = vld [vmem:[#allocation7 + $0x1e0] ss:$8 sps:$4 sm:$0xff]  }
 0x139   :  { %v220_v60 = vadd.f32 %v219_v58, %v121_v55  ;;  %v221_v61 = vpop.f32.mrb[2].mxu1  ;;  %v1385_v58 = vld [vmem:[#allocation7 + $0x1f0] ss:$8 sps:$4 sm:$0xff]  }
 0x13a   :  { %1412 = vtanh.f32 %v218_v57  ;;  %v222_v63 = vadd.f32 %v221_v61, %v117_v54  ;;  %v223_v0 = vpop.f32.mrb[3].mxu1  ;;  %v1379_v54 = vld [vmem:[#allocation7 + $0x1d0] ss:$8 sps:$4 sm:$0xff]   ;;  %v1387_v57 = vld [vmem:[#allocation7 + $0x1f4] ss:$8 sps:$4 sm:$0xff]   ;;  %v1396_v61 = vld [vmem:[#allocation8 + $0x60] sm:$0xff]  }
 0x13b   :  { %1414 = vtanh.f32 %v220_v60  ;;  %v224_v1 = vadd.f32 %v223_v0, %v121_v55  ;;  %v1384_v55 = vld [vmem:[#allocation7 + $0x1e4] ss:$8 sps:$4 sm:$0xff]   ;;  %v1395_v60 = vld [vmem:[#allocation8 + $0x18] sm:$0xff]  }
 0x13c   :  { %1416 = vtanh.f32 %v222_v63  ;;  %1212 = vmatpush3.bf16.msra.mxu1 %v1395_v60  ;;  %v1398_v63 = vld [vmem:[#allocation8 + $0x68] sm:$0xff]  }
 0x13d   :  { %1418 = vtanh.f32 %v224_v1  ;;  %1213 = vmatprep.subr.bf16.mxu1 %v1396_v61  ;;  %v1399_v0 = vld [vmem:[#allocation8 + $0x28] sm:$0xff]   ;;  %v1400_v1 = vld [vmem:[#allocation8 + $0x70] sm:$0xff]  }
 0x13f   :  { %v260_v4 = vpop.f32.mrb[4].mxu1 }
 0x140   :  { %v261_v5 = vadd.f32 %v260_v4, %v125_v2  ;;  %v262_v6 = vpop.f32.mrb[5].mxu1  ;;  %1214 = vmatpush3.bf16.msra.mxu1 %v1397_v62  ;;  %v1403_v4 = vld [vmem:[#allocation8 + $0x38] sm:$0xff]  }
 0x141   :  { %v263_v7 = vadd.f32 %v262_v6, %v129_v3  ;;  %v264_v8 = vpop.f32.mrb[6].mxu1  ;;  %1215 = vmatprep.subr.bf16.mxu1 %v1398_v63  ;;  %v345_v6 = vld [vmem:[%s1777_s4] sm:$0x3] }
 0x142   :  { %1420 = vtanh.f32 %v261_v5  ;;  %v265_v9 = vadd.f32 %v264_v8, %v125_v2  ;;  %v266_v10 = vpop.f32.mrb[7].mxu1  ;;  %v1401_v2 = vld [vmem:[#allocation8 + $0x30] sm:$0xff]   ;;  %v1600_v5 = vmov 0.0   ;;  %v354_v8 = vrot.slane %v345_v6, %v120_v53  ;;  %v1405_v53 = vld [vmem:[#allocation10 + $0x8] sm:$0xff]  }
 0x143   :  { %1422 = vtanh.f32 %v263_v7  ;;  %v267_v11 = vadd.f32 %v266_v10, %v129_v3  ;;  %v1402_v3 = vld [vmem:[#allocation8 + $0x78] sm:$0xff]   ;;  %v350_v7 = vrot.slane %v345_v6, %v116_v51 }
 0x144   :  { %v1413_v12 = vpop.eup %1412  ;;  %1424 = vtanh.f32 %v265_v9  ;;  %1216 = vmatpush3.bf16.msra.mxu1 %v1399_v0 }
 0x145   :  { %v1415_v13 = vpop.eup %1414  ;;  %1426 = vtanh.f32 %v267_v11  ;;  %1217 = vmatprep.subr.bf16.mxu1 %v1400_v1 }
 0x146   :  { %v1417_v14 = vpop.eup %1416 }
 0x147   :  { %v1419_v15 = vpop.eup %1418  ;;  %v277_v16 = vpack.c.bf16 %v1417_v14, %v1413_v12 }
 0x148   :  { %v278_v17 = vpack.c.bf16 %v1419_v15, %v1415_v13  ;;  %1218 = vmatpush3.bf16.msra.mxu1 %v1401_v2 }
 0x149   :  { %1219 = vmatprep.subr.bf16.mxu1 %v1402_v3 }
 0x14a   :  { %709 = vmatprep.mubr.bf16.mxu0 %v278_v17 }
 0x14b   :  { %710 = vmatmul.mubr.bf16.vlgmr.msra.gmra.mrb[0].mxu0 %v277_v16 }
 0x14c   :  { %v1741_v20 = vpop.eup %1420  ;;  %721 = vmatpush1.bf16.msra.mxu0 %v1340_v18  ;;  %1220 = vmatpush3.bf16.msra.mxu1 %v1403_v4 }
 0x14d   :  { %v1423_v22 = vpop.eup %1422  ;;  %722 = vmatprep.subr.bf16.mxu0 %v1345_v19  ;;  %1236 = vmatprep.subr.bf16.mxu1 %v1600_v5 }
 0x14e   :  { %v1425_v24 = vpop.eup %1424 }
 0x14f   :  { %v1427_v25 = vpop.eup %1426  ;;  %v279_v26 = vpack.c.bf16 %v1425_v24, %v1741_v20  ;;  %v1408_v24 = vld [vmem:[#allocation10 + $0x20] sm:$0xff]  }
 0x150   :  { %723 = vmatpush1.bf16.msra.mxu0 %v1343_v21  ;;  %v280_v28 = vpack.c.bf16 %v1427_v25, %v1423_v22  ;;  %v1406_v22 = vld [vmem:[#allocation10 + $0x10] sm:$0xff]   ;;  %v1409_v25 = vld [vmem:[#allocation10 + $0x28] sm:$0xff]  }
 0x151   :  { %724 = vmatprep.subr.bf16.mxu0 %v1348_v23  ;;  %v1407_v23 = vld [vmem:[#allocation10 + $0x18] sm:$0xff]  }
 0x152   :  { %752 = vmatprep.mubr.bf16.mxu0 %v280_v28 }
 0x154   :  { %725 = vmatpush1.bf16.msra.mxu0 %v1346_v27  ;;  %v1411_v27 = vld [vmem:[#allocation10 + $0x38] sm:$0xff]  }
 0x155   :  { %726 = vmatprep.subr.bf16.mxu0 %v1351_v29  ;;  %v1179_v29 = vld [vmem:[%s1779_s6] ss:$0 sm:$0xff]  ;;  %s1602_s6 = smov [#allocation11]  }
 0x158   :  { %727 = vmatpush1.bf16.msra.mxu0 %v1349_v30 }
 0x159   :  { %728 = vmatprep.subr.bf16.mxu0 %v1354_v31 }
 0x15c   :  { %729 = vmatpush1.bf16.msra.mxu0 %v1352_v32 }
 0x15d   :  { %730 = vmatprep.subr.bf16.mxu0 %v1357_v33 }
 0x160   :  { %731 = vmatpush1.bf16.msra.mxu0 %v1355_v34 }
 0x161   :  { %732 = vmatprep.subr.bf16.mxu0 %v1360_v35 }
 0x164   :  { %733 = vmatpush1.bf16.msra.mxu0 %v1358_v36 }
 0x165   :  { %734 = vmatprep.subr.bf16.mxu0 %v1363_v37 }
 0x168   :  { %735 = vmatpush1.bf16.msra.mxu0 %v1361_v38 }
 0x169   :  { %736 = vmatprep.subr.bf16.mxu0 %v1366_v39 }
 0x16c   :  { %737 = vmatpush1.bf16.msra.mxu0 %v1364_v40  ;;  %v1196_v40 = vld [vmem:[%s1781_s8] ss:$0 sm:$0xff]  ;;  %s1090_s8 = sshll.u32 %s1602_s6, 4  ;;  %s1091_s8 = int_to_ptr.vmem [resolvable:$true] %s1090_s8 }
 0x16d   :  { %738 = vmatprep.subr.bf16.mxu0 %v1369_v41  ;;  %s1558_s13 = scalar_lea.vmem %s1091_s8, 256  ;;  %p1563_p13 = scmp.lt.s32.totalorder %s1091_s8, %s1091_s8 }
 0x16e   :  { %p1559_p12 = scmp.ne.s32.totalorder %s1091_s8, %s1558_s13  ;;  %p1564_p0 = scmp.lt.s32.totalorder %s1558_s13, %s1558_s13 }
 0x170   :  { %739 = vmatpush1.bf16.msra.mxu0 %v1367_v42  ;;  %p1565_p1 = por %p1564_p0, %p1563_p13 }
 0x171   :  { %740 = vmatprep.subr.bf16.mxu0 %v1372_v43 }
 0x172   :  { %p1566_p2 = pnand %p1565_p1, %p1559_p12 }
 0x174   :  { %741 = vmatpush1.bf16.msra.mxu0 %v1370_v44 }
 0x175   :  { %742 = vmatprep.subr.bf16.mxu0 %v1375_v45 }
 0x178   :  { %743 = vmatpush1.bf16.msra.mxu0 %v1373_v46 }
 0x179   :  { %744 = vmatprep.subr.bf16.mxu0 %v1378_v47 }
 0x17c   :  { %745 = vmatpush1.bf16.msra.mxu0 %v1376_v48 }
 0x17d   :  { %746 = vmatprep.subr.bf16.mxu0 %v1381_v52 }
 0x180   :  { %747 = vmatpush1.bf16.msra.mxu0 %v1379_v54 }
 0x181   :  { %748 = vmatprep.subr.bf16.mxu0 %v1384_v55 }
 0x184   :  { %749 = vmatpush1.bf16.msra.mxu0 %v1382_v56 }
 0x185   :  { %750 = vmatprep.subr.bf16.mxu0 %v1387_v57 }
 0x188   :  { %751 = vmatpush1.bf16.msra.mxu0 %v1385_v58 }
 0x18b   :  { %753 = vmatmul.mubr.bf16.vlgmr.msra.gmra.mrb[0].mxu0 %v279_v26  ;;  %v1410_v26 = vld [vmem:[#allocation10 + $0x30] sm:$0xff]  }
 0x25e   :  { %v754_v9 = vpop.f32.mrb[0].mxu0 }
 0x25f   :  { %v1256_v10 = vadd.f32 %v754_v9, %v350_v7  ;;  %v756_v11 = vpop.f32.mrb[1].mxu0 }
 0x260   :  { %v1257_v12 = vadd.f32 %v756_v11, %v354_v8  ;;  %v758_v13 = vpop.f32.mrb[2].mxu0 }
 0x261   :  { %1428 = vtanh.f32 %v1256_v10  ;;  %v1258_v14 = vadd.f32 %v758_v13, %v350_v7  ;;  %v760_v15 = vpop.f32.mrb[3].mxu0 }
 0x262   :  { %1430 = vtanh.f32 %v1257_v12  ;;  %v1259_v16 = vadd.f32 %v760_v15, %v354_v8 }
 0x263   :  { %1432 = vtanh.f32 %v1258_v14 }
 0x264   :  { %1434 = vtanh.f32 %v1259_v16 }
 0x26b   :  { %v1429_v17 = vpop.eup %1428 }
 0x26c   :  { %v1431_v18 = vpop.eup %1430 }
 0x26d   :  { %v1433_v19 = vpop.eup %1432 }
 0x26e   :  { %v1435_v20 = vpop.eup %1434  ;;  %v767_v51 = vpack.c.bf16 %v1433_v19, %v1429_v17 }
 0x26f   :  { %v768_v21 = vpack.c.bf16 %v1435_v20, %v1431_v18 }
 0x271   :  { %936 = vmatprep.mubr.bf16.mxu1 %v768_v21 }
 0x272   :  { %937 = vmatmul.mubr.bf16.vlgmr.msra.gmra.mrb[8].mxu1 %v767_v51 }
 0x273   :  { %1237 = vmatpush3.bf16.msra.mxu1 %v1404_v50  ;;  %1252 = vmatprep.mubr.msk.bf16.mxu1 %vm1601_vm1, %v1600_v5 }
 0x274   :  { %1238 = vmatprep.subr.bf16.mxu1 %v1600_v5 }
 0x277   :  { %1239 = vmatpush3.bf16.msra.mxu1 %v1405_v53 }
 0x278   :  { %1240 = vmatprep.subr.bf16.mxu1 %v1600_v5 }
 0x27b   :  { %1241 = vmatpush3.bf16.msra.mxu1 %v1406_v22 }
 0x27c   :  { %1242 = vmatprep.subr.bf16.mxu1 %v1600_v5 }
 0x27f   :  { %1243 = vmatpush3.bf16.msra.mxu1 %v1407_v23 }
 0x280   :  { %1244 = vmatprep.subr.bf16.mxu1 %v1600_v5 }
 0x283   :  { %1245 = vmatpush3.bf16.msra.mxu1 %v1408_v24 }
 0x284   :  { %1246 = vmatprep.subr.bf16.mxu1 %v1600_v5 }
 0x287   :  { %1247 = vmatpush3.bf16.msra.mxu1 %v1409_v25 }
 0x288   :  { %1248 = vmatprep.subr.bf16.mxu1 %v1600_v5 }
 0x28b   :  { %1249 = vmatpush3.bf16.msra.mxu1 %v1410_v26 }
 0x28c   :  { %1250 = vmatprep.subr.bf16.mxu1 %v1600_v5 }
 0x28f   :  { %1251 = vmatpush3.bf16.msra.mxu1 %v1411_v27 }
 0x345   :  { %v1221_v28 = vpop.f32.mrb[8].mxu1 }
 0x346   :  { %v1222_v30 = vpop.f32.mrb[9].mxu1 }
 0x347   :  { %v1223_v31 = vadd.f32 %v1222_v30, %v1221_v28  ;;  %v1224_v32 = vpop.f32.mrb[10].mxu1 }
 0x348   :  { %v1225_v33 = vpop.f32.mrb[11].mxu1 }
 0x349   :  { %v939_v34 = vadd.f32 %v1223_v31, %v1179_v29  ;;  %v1226_v35 = vadd.f32 %v1225_v33, %v1224_v32 }
 0x34b   :  { %v942_v36 = vadd.f32 %v1226_v35, %v1179_v29  ;;  %1436 = vtanh.f32 %v939_v34 }
 0x34d   :  { %1438 = vtanh.f32 %v942_v36 }
 0x355   :  { %v1437_v37 = vpop.eup %1436 }
 0x357   :  { %v1439_v38 = vpop.eup %1438 }
 0x358   :  { %v947_v39 = vpack.c.bf16 %v1439_v38, %v1437_v37 }
 0x35a   :  { %1253 = vmatmul.mubr.bf16.vlgmr.msra.gmra.mrb[12].mxu1 %v947_v39 }
 0x42d   :  { %v1053_v41 = vpop.f32.mrb[12].mxu1 }
 0x42e   :  { %v1054_v42 = vadd.f32 %v1196_v40, %v1053_v41  ;;  %v1254_v43 = vpop.f32.mrb[13].mxu1 }
 0x42f   :  { %v1056_v44 = vpop.f32.mrb[14].mxu1 }
 0x430   :  { %v1067_v45 = vmin.f32 %v1054_v42, 20.0  ;;  %v1057_v46 = vadd.f32 %v1196_v40, %v1056_v44  ;;  %v1255_v47 = vpop.f32.mrb[15].mxu1  ;;  %vm1065_vm5 = vcmp.gt.f32.partialorder %v1054_v42, 20.0 }
 0x432   :  { %v1069_v48 = vmul.f32 1.442695, %v1067_v45  ;;  %v1068_v52 = vmin.f32 %v1057_v46, 20.0  ;;  %vm1066_vm6 = vcmp.gt.f32.partialorder %v1057_v46, 20.0 }
 0x434   :  { %1440 = vpow2.f32 %v1069_v48  ;;  %v1071_v54 = vmul.f32 1.442695, %v1068_v52 }
 0x436   :  { %1442 = vpow2.f32 %v1071_v54 }
 0x43e   :  { %v1441_v55 = vpop.eup %1440 }
 0x43f   :  { %v1073_v56 = vadd.f32 1.0, %v1441_v55 }
 0x440   :  { %v1443_v57 = vpop.eup %1442 }
 0x441   :  { %1444 = vlog2.f32 %v1073_v56  ;;  %v1074_v58 = vadd.f32 1.0, %v1443_v57 }
 0x443   :  { %1446 = vlog2.f32 %v1074_v58 }
 0x44b   :  { %v1445_v60 = vpop.eup %1444 }
 0x44c   :  { %v1076_v61 = vmul.f32 0.6931472, %v1445_v60 }
 0x44d   :  { %v1447_v62 = vpop.eup %1446 }
 0x44e   :  { %v1078_v63 = vmul.f32 0.6931472, %v1447_v62  ;;  %v1079_v0 = vsel %vm1065_vm5, %v1054_v42, %v1076_v61 }
 0x44f   :  { %v1081_v1 = vsel %vm1064_vm4, %v1079_v0, %v1054_v42 }
 0x450   :  { %v1080_v2 = vsel %vm1066_vm6, %v1057_v46, %v1078_v63  ;;  %1083 = vst [vmem:[#allocation11] sm:$0xff] %v1081_v1 }
 0x451   :  { %v1082_v3 = vsel %vm1064_vm4, %v1080_v2, %v1057_v46 }
 0x452   :  { %1084 = vst [vmem:[#allocation11 + $0x8] sm:$0xff] %v1082_v3 }
 0x453   :  { %1569 = shalt.err (!%p1566_p2)
}
 0x454   :  { %s1570_s16 = scalar_lea.hbm %s1782_s9, 256 }
 0x455   :  { %p1571_p3 = scmp.ne.s32.totalorder %s1782_s9, %s1570_s16  ;;  %p1574_p4 = scmp.lt.u32.totalorder %s1570_s16, %s1782_s9 }
 0x457   :  { %p1576_p5 = pnand %p1574_p4, %p1571_p3 }
 0x459   :  { %1579 = shalt.err (!%p1576_p5)
}
 0x45a   :  { %1096 = dma.vmem_to_hbm [thread:$0]  %s1091_s8, 256, %s1782_s9, [#allocation4], %s1596_s0, %s1596_s0, %s1597_s26  }
 0x45b   :  { %1586 = dma.done.wait [#allocation4], 256  }
 0x45c   :  { %1587 = vsyncadd [#allocation4], 4294967040 }
 0x45d   :  { %1100 = vsyncpa [#allocation3], 1 }
 0x45e   :  { %1101 = vsyncpa [#allocation6], 1 }
 0x45f   :  { %1102 = vsyncpa [#allocation9], 1 }
 0x460   :  { %1103 = vsyncpa [#allocation4], 1 }

</bundles_post_ra>
